<compile_context>
chip_gen: v7x
topology: tpu7x:2x2x1
jax: 0.10.0
libtpu: 0.0.40
codegen_flags: <defaults>
</compile_context>

<pallas_src>
import functools

import jax
import jax.numpy as jnp
from jax.experimental import pallas as pl
from jax.experimental.pallas import tpu as pltpu

CLASS_NUM = 19
MOMENTUM = 0.9
IGNORE_LABEL = 255


def _round_up(x, m):
    return ((x + m - 1) // m) * m


def _proto_update_kernel(lab_ref, feat_ref, proto_in_ref, amount_in_ref,
                         proto_out_ref, amount_out_ref,
                         sums_scr, counts_scr, valid_scr,
                         *, n_pixels, tile_n, class_num, momentum,
                         ignore_label, ragged):
    pid = pl.program_id(0)

    @pl.when(pid == 0)
    def _init():
        sums_scr[...] = jnp.zeros_like(sums_scr)
        counts_scr[...] = jnp.zeros_like(counts_scr)
        valid_scr[...] = jnp.zeros_like(valid_scr)

    labels = lab_ref[...]                      # (1, tile_n) int32
    feats = feat_ref[...]                      # (tile_n, C) bf16/f32
    k_rows = sums_scr.shape[0]

    if ragged:
        # Mask the ragged tail (last tile reads past N): labels -> IGNORE,
        # feature rows -> 0 via select (OOB contents are undefined, may be NaN).
        base = pid * tile_n
        col_ids = base + jax.lax.broadcasted_iota(jnp.int32, (1, tile_n), 1)
        labels = jnp.where(col_ids < n_pixels, labels, ignore_label)
        row_ids = base + jax.lax.broadcasted_iota(jnp.int32, (tile_n, 1), 0)
        feats = jnp.where(row_ids < n_pixels, feats, jnp.zeros_like(feats))

    # One-hot (k_rows, tile_n): rows 0..K-1 are class indicators; 255 never matches.
    class_ids = jax.lax.broadcasted_iota(jnp.int32, (k_rows, tile_n), 0)
    onehot = class_ids == labels               # bool

    # Per-class feature sums on the MXU, accumulated in f32.
    sums_scr[...] += jnp.dot(onehot.astype(feats.dtype), feats,
                             preferred_element_type=jnp.float32)
    # Per-class pixel counts (exact integers in f32) via XLU lane reduction.
    counts_scr[...] += jnp.sum(onehot.astype(jnp.float32), axis=1, keepdims=True)
    # Total valid-pixel count from the small labels block.
    valid_scr[...] += jnp.sum((labels != ignore_label).astype(jnp.float32),
                              axis=1, keepdims=True)

    @pl.when(pid == pl.num_programs(0) - 1)
    def _finalize():
        counts = counts_scr[0:class_num, :]                    # (K, 1)
        present = counts > 0.0
        inv = 1.0 / jnp.where(present, counts, 1.0)            # column-only divide
        mean = sums_scr[0:class_num, :] * inv                  # broadcast multiply
        proto_old = proto_in_ref[...]
        proto_new = (1.0 - momentum) * mean + momentum * proto_old
        proto_out_ref[...] = jnp.where(present, proto_new, proto_old).astype(
            proto_out_ref.dtype)
        amount_out_ref[...] = (amount_in_ref[...]
                               + jnp.where(present, valid_scr[...], 0.0)).astype(
            amount_out_ref.dtype)


def prototype_dist_estimator_forward(features, labels, proto, amount, *, tile_n=None):
    """features: (N, C) float (bf16 or f32); labels: (N,) int; proto: (K, C) f32;
    amount: (K,) f32.  Returns (new_proto, new_amount); forward() returns new_proto."""
    N, C = features.shape
    K = proto.shape[0]
    dtype_bytes = jnp.dtype(features.dtype).itemsize

    # --- tile sizing by bytes: ~3 MiB feature block per grid step -------------
    if tile_n is None:
        target_bytes = 3 << 20
        tile_n = max(256, min(target_bytes // max(1, C * dtype_bytes), 32768))
    tile_n = int(tile_n)
    tile_n = max(128, _round_up(min(tile_n, N), 128))
    grid_n = pl.cdiv(N, tile_n)
    ragged = (N % tile_n) != 0

    K_ROWS = _round_up(K, 8)

    # Only cheap, tiny reshapes/casts on the host side (no feature copies).
    labels2d = labels.reshape(1, N).astype(jnp.int32)
    proto_in = proto.astype(jnp.float32)                   # (K, C)
    amount_in = amount.astype(jnp.float32).reshape(K, 1)   # (K, 1)

    # --- explicit VMEM budget (keeps double-buffering on v5e/v7x) -------------
    feat_blk = tile_n * C * dtype_bytes
    lab_blk = 8 * tile_n * 4                               # (1,tile_n) i32, sublane-padded
    scratch = (K_ROWS * max(C, 128) + K_ROWS * 128 + 128) * 4
    resident = 4 * (K * max(C, 128) + K * 128) * 4         # proto/amount in + out
    vmem_est = 2 * feat_blk + 2 * lab_blk + scratch + resident + (4 << 20)
    vmem_limit = int(min(max(vmem_est, 16 << 20), 40 << 20))

    kernel = functools.partial(
        _proto_update_kernel,
        n_pixels=N, tile_n=tile_n, class_num=K, momentum=MOMENTUM,
        ignore_label=IGNORE_LABEL, ragged=ragged)

    out_proto, out_amount = pl.pallas_call(
        kernel,
        out_shape=(jax.ShapeDtypeStruct((K, C), jnp.float32),
                   jax.ShapeDtypeStruct((K, 1), jnp.float32)),
        grid=(grid_n,),
        in_specs=[
            pl.BlockSpec((1, tile_n), lambda n: (0, n)),     # labels   (streamed)
            pl.BlockSpec((tile_n, C), lambda n: (n, 0)),     # features (streamed, no pad)
            pl.BlockSpec((K, C), lambda n: (0, 0)),          # proto    (resident)
            pl.BlockSpec((K, 1), lambda n: (0, 0)),          # amount   (resident)
        ],
        out_specs=(
            pl.BlockSpec((K, C), lambda n: (0, 0)),
            pl.BlockSpec((K, 1), lambda n: (0, 0)),
        ),
        scratch_shapes=[
            pltpu.VMEM((K_ROWS, C), jnp.float32),            # per-class feature sums
            pltpu.VMEM((K_ROWS, 1), jnp.float32),            # per-class counts
            pltpu.VMEM((1, 1), jnp.float32),                 # total valid-pixel count
        ],
        compiler_params=pltpu.CompilerParams(
            dimension_semantics=("arbitrary",),
            vmem_limit_bytes=vmem_limit),
    )(labels2d, features, proto_in, amount_in)

    return out_proto, out_amount.reshape(K)


def _reference(features, labels, proto, amount):
    """Pure-JAX reference mirroring the torch update loop (f32 math)."""
    K = proto.shape[0]
    f = features.astype(jnp.float32)
    valid = labels != IGNORE_LABEL
    m_valid = jnp.sum(valid.astype(jnp.float32))
    onehot = ((labels[None, :] == jnp.arange(K)[:, None]) & valid[None, :]).astype(
        jnp.float32)
    counts = onehot.sum(axis=1, keepdims=True)
    present = counts > 0
    sums = jnp.dot(onehot, f, precision=jax.lax.Precision.HIGHEST)
    mean = sums / jnp.where(present, counts, 1.0)
    new_proto = jnp.where(present, (1.0 - MOMENTUM) * mean + MOMENTUM * proto, proto)
    new_amount = amount + jnp.where(present[:, 0], m_valid, 0.0)
    return new_proto, new_amount


if __name__ == "__main__":
    key = jax.random.PRNGKey(0)
    kf, kl, km, kp, ka = jax.random.split(key, 5)

    # Small shapes: batch=2, feature_num=32, 15x15 spatial -> N=450 flattened pixels
    # (deliberately NOT a tile multiple, to exercise the in-kernel ragged-tail path).
    B, C, H, W = 2, 32, 15, 15
    N = B * H * W

    feats_nchw = jax.random.normal(kf, (B, C, H, W), dtype=jnp.float32)
    features = jnp.transpose(feats_nchw, (0, 2, 3, 1)).reshape(N, C).astype(jnp.bfloat16)

    # Classes 12..18 absent (tests the "unchanged prototype" path); ~10% ignored.
    labels = jax.random.randint(kl, (N,), 0, 12, dtype=jnp.int32)
    ignore_mask = jax.random.uniform(km, (N,)) < 0.1
    labels = jnp.where(ignore_mask, IGNORE_LABEL, labels)

    # Non-trivial module state so absent-class rows are verifiably untouched.
    proto0 = jax.random.normal(kp, (CLASS_NUM, C), dtype=jnp.float32)
    amount0 = jax.random.uniform(ka, (CLASS_NUM,), dtype=jnp.float32) * 10.0

    ref_proto, ref_amount = _reference(features, labels, proto0, amount0)

    # Run 1: forced tile_n=128 -> 4-step grid over N=450, exercises cross-tile
    # accumulation AND the in-kernel ragged tail masking.
    new_proto, new_amount = prototype_dist_estimator_forward(
        features, labels, proto0, amount0, tile_n=128)
    new_proto = jax.block_until_ready(new_proto)
    new_amount = jax.block_until_ready(new_amount)
    assert jnp.allclose(new_proto, ref_proto, atol=1e-4, rtol=1e-4), \
        float(jnp.max(jnp.abs(new_proto - ref_proto)))
    assert jnp.allclose(new_amount, ref_amount, atol=1e-3, rtol=1e-5)

    # Run 2: default byte-based tile sizing (single ragged tile here).
    new_proto2, new_amount2 = prototype_dist_estimator_forward(
        features, labels, proto0, amount0)
    new_proto2 = jax.block_until_ready(new_proto2)
    new_amount2 = jax.block_until_ready(new_amount2)
    assert jnp.allclose(new_proto2, ref_proto, atol=1e-4, rtol=1e-4), \
        float(jnp.max(jnp.abs(new_proto2 - ref_proto)))
    assert jnp.allclose(new_amount2, ref_amount, atol=1e-3, rtol=1e-5)

    print("KERNEL_OK")
</pallas_src>

<mosaic_0001>
module attributes {stable_mosaic.version = 11 : i64} {
  func.func @_proto_update_kernel(%arg0: i32, %arg1: memref<1x128xi32, #tpu.memory_space<vmem>>, %arg2: memref<128x32xbf16, #tpu.memory_space<vmem>>, %arg3: memref<19x32xf32, #tpu.memory_space<vmem>>, %arg4: memref<19x1xf32, #tpu.memory_space<vmem>>, %arg5: memref<19x32xf32, #tpu.memory_space<vmem>>, %arg6: memref<19x1xf32, #tpu.memory_space<vmem>>, %arg7: memref<24x32xf32, #tpu.memory_space<vmem>>, %arg8: memref<24x1xf32, #tpu.memory_space<vmem>>, %arg9: memref<1x1xf32, #tpu.memory_space<vmem>>) attributes {dimension_semantics = [#tpu.dimension_semantics<arbitrary>], iteration_bounds = array<i64: 4>, scalar_prefetch = 0 : i64, scratch_operands = 3 : i64, tpu.core_type = #tpu.core_type<tc>, window_params = [{transform_indices = @transform_0, window_bounds = array<i64: 1, 128>}, {transform_indices = @transform_1, window_bounds = array<i64: 128, 32>}, {pipeline_mode = #tpu.pipeline_mode<synchronous>, transform_indices = @transform_2, window_bounds = array<i64: 19, 32>}, {pipeline_mode = #tpu.pipeline_mode<synchronous>, transform_indices = @transform_3, window_bounds = array<i64: 19, 1>}, {pipeline_mode = #tpu.pipeline_mode<synchronous>, transform_indices = @transform_4, window_bounds = array<i64: 19, 32>}, {pipeline_mode = #tpu.pipeline_mode<synchronous>, transform_indices = @transform_5, window_bounds = array<i64: 19, 1>}]} {
    %c0_i32 = arith.constant 0 : i32
    %0 = arith.cmpi eq, %arg0, %c0_i32 : i32
    %1 = arith.extui %0 : i1 to i32
    %c0_i32_0 = arith.constant 0 : i32
    %2 = arith.cmpi ne, %1, %c0_i32_0 : i32
    scf.if %2 {
      %cst_22 = arith.constant 0.000000e+00 : f32
      %51 = vector.broadcast %cst_22 : f32 to vector<24x32xf32>
      %c0_23 = arith.constant 0 : index
      %c0_24 = arith.constant 0 : index
      %52 = vector.load %arg7[%c0_23, %c0_24] : memref<24x32xf32, #tpu.memory_space<vmem>>, vector<24x32xf32>
      tpu.vector_store %arg7[%c0_23, %c0_24], %51 {strides = array<i32>} : memref<24x32xf32, #tpu.memory_space<vmem>>, vector<24x32xf32>,
      %cst_25 = arith.constant 0.000000e+00 : f32
      %53 = vector.broadcast %cst_25 : f32 to vector<24x1xf32>
      %c0_26 = arith.constant 0 : index
      %c0_27 = arith.constant 0 : index
      %54 = vector.load %arg8[%c0_26, %c0_27] : memref<24x1xf32, #tpu.memory_space<vmem>>, vector<24x1xf32>
      tpu.vector_store %arg8[%c0_26, %c0_27], %53 {strides = array<i32>} : memref<24x1xf32, #tpu.memory_space<vmem>>, vector<24x1xf32>,
      %cst_28 = arith.constant 0.000000e+00 : f32
      %55 = vector.broadcast %cst_28 : f32 to vector<1x1xf32>
      %c0_29 = arith.constant 0 : index
      %c0_30 = arith.constant 0 : index
      %56 = vector.load %arg9[%c0_29, %c0_30] : memref<1x1xf32, #tpu.memory_space<vmem>>, vector<1x1xf32>
      tpu.vector_store %arg9[%c0_29, %c0_30], %55 {strides = array<i32>} : memref<1x1xf32, #tpu.memory_space<vmem>>, vector<1x1xf32>,
    } else {
    }
    %c0 = arith.constant 0 : index
    %c0_1 = arith.constant 0 : index
    %3 = vector.load %arg1[%c0, %c0_1] : memref<1x128xi32, #tpu.memory_space<vmem>>, vector<1x128xi32>
    %c0_2 = arith.constant 0 : index
    %c0_3 = arith.constant 0 : index
    %4 = vector.load %arg2[%c0_2, %c0_3] : memref<128x32xbf16, #tpu.memory_space<vmem>>, vector<128x32xbf16>
    %c128_i32 = arith.constant 128 : i32
    %5 = arith.muli %arg0, %c128_i32 : i32
    %6 = tpu.iota {dimensions = array<i32: 1>} : vector<1x128xi32>
    %7 = vector.broadcast %5 : i32 to vector<1x128xi32>
    %8 = arith.addi %7, %6 : vector<1x128xi32>
    %c450_i32 = arith.constant 450 : i32
    %9 = vector.broadcast %c450_i32 : i32 to vector<1x128xi32>
    %10 = arith.cmpi slt, %8, %9 : vector<1x128xi32>
    %c255_i32 = arith.constant 255 : i32
    %11 = vector.broadcast %c255_i32 : i32 to vector<1x128xi32>
    %12 = arith.select %10, %3, %11 : vector<1x128xi1>, vector<1x128xi32>
    %13 = tpu.iota {dimensions = array<i32: 0>} : vector<128x1xi32>
    %14 = vector.broadcast %5 : i32 to vector<128x1xi32>
    %15 = arith.addi %14, %13 : vector<128x1xi32>
    %c450_i32_4 = arith.constant 450 : i32
    %16 = vector.broadcast %c450_i32_4 : i32 to vector<128x1xi32>
    %17 = arith.cmpi slt, %15, %16 : vector<128x1xi32>
    %cst = arith.constant 0.000000e+00 : bf16
    %18 = vector.broadcast %cst : bf16 to vector<128x32xbf16>
    %19 = vector.shape_cast %17 : vector<128x1xi1> to vector<128x1xi1>
    %20 = vector.broadcast %19 : vector<128x1xi1> to vector<128x32xi1>
    %21 = arith.select %20, %4, %18 : vector<128x32xi1>, vector<128x32xbf16>
    %22 = tpu.iota {dimensions = array<i32: 0>} : vector<24x128xi32>
    %23 = vector.broadcast %12 : vector<1x128xi32> to vector<24x128xi32>
    %24 = arith.cmpi eq, %22, %23 : vector<24x128xi32>
    %c0_5 = arith.constant 0 : index
    %c0_6 = arith.constant 0 : index
    %25 = vector.load %arg7[%c0_5, %c0_6] : memref<24x32xf32, #tpu.memory_space<vmem>>, vector<24x32xf32>
    %26 = arith.extui %24 : vector<24x128xi1> to vector<24x128xi32>
    %27 = arith.sitofp %26 : vector<24x128xi32> to vector<24x128xf32>
    %28 = arith.truncf %27 : vector<24x128xf32> to vector<24x128xbf16>
    %cst_7 = arith.constant dense<0.000000e+00> : vector<24x32xf32>
    %29 = tpu.matmul %28, %21, %cst_7 {dimension_numbers = #tpu.dot_dimension_numbers<[1], [0], [0], [1], [0, 0, 1, 1], [], []>} : vector<24x128xbf16>, vector<128x32xbf16>, vector<24x32xf32> -> vector<24x32xf32>
    %30 = arith.addf %25, %29 : vector<24x32xf32>
    %c0_8 = arith.constant 0 : index
    %c0_9 = arith.constant 0 : index
    %31 = vector.load %arg7[%c0_8, %c0_9] : memref<24x32xf32, #tpu.memory_space<vmem>>, vector<24x32xf32>
    tpu.vector_store %arg7[%c0_8, %c0_9], %30 {strides = array<i32>} : memref<24x32xf32, #tpu.memory_space<vmem>>, vector<24x32xf32>,
    %c0_10 = arith.constant 0 : index
    %c0_11 = arith.constant 0 : index
    %32 = vector.load %arg8[%c0_10, %c0_11] : memref<24x1xf32, #tpu.memory_space<vmem>>, vector<24x1xf32>
    %33 = arith.extui %24 : vector<24x128xi1> to vector<24x128xi32>
    %34 = arith.sitofp %33 : vector<24x128xi32> to vector<24x128xf32>
    %cst_12 = arith.constant dense<0.000000e+00> : vector<24xf32>
    %35 = vector.multi_reduction <add>, %34, %cst_12 [1] : vector<24x128xf32> to vector<24xf32>
    %36 = vector.shape_cast %35 : vector<24xf32> to vector<24x1xf32>
    %37 = arith.addf %32, %36 : vector<24x1xf32>
    %c0_13 = arith.constant 0 : index
    %c0_14 = arith.constant 0 : index
    %38 = vector.load %arg8[%c0_13, %c0_14] : memref<24x1xf32, #tpu.memory_space<vmem>>, vector<24x1xf32>
    tpu.vector_store %arg8[%c0_13, %c0_14], %37 {strides = array<i32>} : memref<24x1xf32, #tpu.memory_space<vmem>>, vector<24x1xf32>,
    %c0_15 = arith.constant 0 : index
    %c0_16 = arith.constant 0 : index
    %39 = vector.load %arg9[%c0_15, %c0_16] : memref<1x1xf32, #tpu.memory_space<vmem>>, vector<1x1xf32>
    %c255_i32_17 = arith.constant 255 : i32
    %40 = vector.broadcast %c255_i32_17 : i32 to vector<1x128xi32>
    %41 = arith.cmpi ne, %12, %40 : vector<1x128xi32>
    %42 = arith.extui %41 : vector<1x128xi1> to vector<1x128xi32>
    %43 = arith.sitofp %42 : vector<1x128xi32> to vector<1x128xf32>
    %cst_18 = arith.constant dense<0.000000e+00> : vector<1xf32>
    %44 = vector.multi_reduction <add>, %43, %cst_18 [1] : vector<1x128xf32> to vector<1xf32>
    %45 = vector.shape_cast %44 : vector<1xf32> to vector<1x1xf32>
    %46 = arith.addf %39, %45 : vector<1x1xf32>
    %c0_19 = arith.constant 0 : index
    %c0_20 = arith.constant 0 : index
    %47 = vector.load %arg9[%c0_19, %c0_20] : memref<1x1xf32, #tpu.memory_space<vmem>>, vector<1x1xf32>
    tpu.vector_store %arg9[%c0_19, %c0_20], %46 {strides = array<i32>} : memref<1x1xf32, #tpu.memory_space<vmem>>, vector<1x1xf32>,
    %c3_i32 = arith.constant 3 : i32
    %48 = arith.cmpi eq, %arg0, %c3_i32 : i32
    %49 = arith.extui %48 : i1 to i32
    %c0_i32_21 = arith.constant 0 : i32
    %50 = arith.cmpi ne, %49, %c0_i32_21 : i32
    scf.if %50 {
      %c0_22 = arith.constant 0 : index
      %c0_23 = arith.constant 0 : index
      %51 = vector.load %arg8[%c0_22, %c0_23] : memref<24x1xf32, #tpu.memory_space<vmem>>, vector<19x1xf32>
      %cst_24 = arith.constant 0.000000e+00 : f32
      %52 = vector.broadcast %cst_24 : f32 to vector<19x1xf32>
      %53 = arith.cmpf ogt, %51, %52 : vector<19x1xf32>
      %cst_25 = arith.constant 1.000000e+00 : f32
      %54 = vector.broadcast %cst_25 : f32 to vector<19x1xf32>
      %55 = arith.select %53, %51, %54 : vector<19x1xi1>, vector<19x1xf32>
      %cst_26 = arith.constant 1.000000e+00 : f32
      %56 = vector.broadcast %cst_26 : f32 to vector<19x1xf32>
      %57 = arith.divf %56, %55 : vector<19x1xf32>
      %c0_27 = arith.constant 0 : index
      %c0_28 = arith.constant 0 : index
      %58 = vector.load %arg7[%c0_27, %c0_28] : memref<24x32xf32, #tpu.memory_space<vmem>>, vector<19x32xf32>
      %59 = vector.broadcast %57 : vector<19x1xf32> to vector<19x32xf32>
      %60 = arith.mulf %58, %59 : vector<19x32xf32>
      %c0_29 = arith.constant 0 : index
      %c0_30 = arith.constant 0 : index
      %61 = vector.load %arg3[%c0_29, %c0_30] : memref<19x32xf32, #tpu.memory_space<vmem>>, vector<19x32xf32>
      %cst_31 = arith.constant 1.000000e-01 : f32
      %62 = vector.broadcast %cst_31 : f32 to vector<19x32xf32>
      %63 = arith.mulf %62, %60 : vector<19x32xf32>
      %cst_32 = arith.constant 0.899999976 : f32
      %64 = vector.broadcast %cst_32 : f32 to vector<19x32xf32>
      %65 = arith.mulf %64, %61 : vector<19x32xf32>
      %66 = arith.addf %63, %65 : vector<19x32xf32>
      %67 = vector.shape_cast %53 : vector<19x1xi1> to vector<19x1xi1>
      %68 = vector.broadcast %67 : vector<19x1xi1> to vector<19x32xi1>
      %69 = arith.select %68, %66, %61 : vector<19x32xi1>, vector<19x32xf32>
      %c0_33 = arith.constant 0 : index
      %c0_34 = arith.constant 0 : index
      %70 = vector.load %arg5[%c0_33, %c0_34] : memref<19x32xf32, #tpu.memory_space<vmem>>, vector<19x32xf32>
      tpu.vector_store %arg5[%c0_33, %c0_34], %69 {strides = array<i32>} : memref<19x32xf32, #tpu.memory_space<vmem>>, vector<19x32xf32>,
      %c0_35 = arith.constant 0 : index
      %c0_36 = arith.constant 0 : index
      %71 = vector.load %arg4[%c0_35, %c0_36] : memref<19x1xf32, #tpu.memory_space<vmem>>, vector<19x1xf32>
      %c0_37 = arith.constant 0 : index
      %c0_38 = arith.constant 0 : index
      %72 = vector.load %arg9[%c0_37, %c0_38] : memref<1x1xf32, #tpu.memory_space<vmem>>, vector<1x1xf32>
      %cst_39 = arith.constant 0.000000e+00 : f32
      %73 = vector.shape_cast %72 : vector<1x1xf32> to vector<1x1xf32>
      %74 = vector.broadcast %73 : vector<1x1xf32> to vector<19x1xf32>
      %75 = vector.broadcast %cst_39 : f32 to vector<19x1xf32>
      %76 = arith.select %53, %74, %75 : vector<19x1xi1>, vector<19x1xf32>
      %77 = arith.addf %71, %76 : vector<19x1xf32>
      %c0_40 = arith.constant 0 : index
      %c0_41 = arith.constant 0 : index
      %78 = vector.load %arg6[%c0_40, %c0_41] : memref<19x1xf32, #tpu.memory_space<vmem>>, vector<19x1xf32>
      tpu.vector_store %arg6[%c0_40, %c0_41], %77 {strides = array<i32>} : memref<19x1xf32, #tpu.memory_space<vmem>>, vector<19x1xf32>,
    } else {
    }
    return
  }
  func.func @transform_0(%arg0: i32) -> (i32, i32) {
    %c0_i32 = arith.constant 0 : i32
    %c0_i32_0 = arith.constant 0 : i32
    return %c0_i32, %arg0 : i32, i32
  }
  func.func @transform_1(%arg0: i32) -> (i32, i32) {
    %c0_i32 = arith.constant 0 : i32
    %c0_i32_0 = arith.constant 0 : i32
    return %arg0, %c0_i32 : i32, i32
  }
  func.func @transform_2(%arg0: i32) -> (i32, i32) {
    %c0_i32 = arith.constant 0 : i32
    %c0_i32_0 = arith.constant 0 : i32
    %c0_i32_1 = arith.constant 0 : i32
    return %c0_i32, %c0_i32_0 : i32, i32
  }
  func.func @transform_3(%arg0: i32) -> (i32, i32) {
    %c0_i32 = arith.constant 0 : i32
    %c0_i32_0 = arith.constant 0 : i32
    %c0_i32_1 = arith.constant 0 : i32
    return %c0_i32, %c0_i32_0 : i32, i32
  }
  func.func @transform_4(%arg0: i32) -> (i32, i32) {
    %c0_i32 = arith.constant 0 : i32
    %c0_i32_0 = arith.constant 0 : i32
    %c0_i32_1 = arith.constant 0 : i32
    return %c0_i32, %c0_i32_0 : i32, i32
  }
  func.func @transform_5(%arg0: i32) -> (i32, i32) {
    %c0_i32 = arith.constant 0 : i32
    %c0_i32_0 = arith.constant 0 : i32
    %c0_i32_1 = arith.constant 0 : i32
    return %c0_i32, %c0_i32_0 : i32, i32
  }
}

</mosaic_0001>

<bundles_post_ra>
// kernel: tpu_custom_call.1
= control target key start
LH: loop header
LB: loop body
LE: loop exit
PB: predicated region body
PF: predicated region fallthrough
CT: control target
= control target key end

     0   :  { %11 = vsyncpa [#allocation6], 0  ;;  %s866_s18 = smov 0   ;;  %s1117_s0 = inlined_call_operand.vmem [shape: s32[1,450], index: 0, kind: input, shape index: {}]   ;;  %s1118_s1 = inlined_call_operand.vmem [shape: bf16[450,32], index: 1, kind: input, shape index: {}]   ;;  %s1119_s2 = inlined_call_operand.vmem [shape: f32[19,32], index: 2, kind: input, shape index: {}]   ;;  %s1120_s3 = inlined_call_operand.vmem [shape: f32[19,1], index: 3, kind: input, shape index: {}]   ;;  %s1121_s4 = inlined_call_operand.hbm [shape: f32[19,32], index: 4, kind: output, shape index: {0}]   ;;  %s1122_s5 = inlined_call_operand.vmem [shape: f32[19,1], index: 5, kind: output, shape index: {1}]  }
   0x1 LB: > { %s872_s19 = sadd.s32 4294967295, %s827_s18   ;;  %p705_p0 = scmp.ge.s32.totalorder %s827_s18, 1  ;;  %s827_s18 = sphi %s866_s18, %s17_s18  }
   0x2   : > { %p198_p1 = scmp.lt.s32.totalorder %s827_s18, 5 }
   0x4   : > { %p199_p2 = pnand %p705_p0, %p198_p1 }
   0x5   : > { %p228_p3 = scmp.lt.s32.totalorder (!%p199_p2), %s872_s19, 3  ;;  %s706_s20 = sshll.u32 (!%p199_p2), %s872_s19, 4 }
   0x6   : > { %202 = sbr.rel (%p199_p2) target bundleno = 378 (0x17a), region = 36  ;;  %p236_p4 = scmp.lt.s32.totalorder (!%p199_p2), %s706_s20, 56 }
   0x7   : > { %p708_p5 = scmp.ne.s32.totalorder (!%p199_p2), %s872_s19, 0 }
   0xd   : > { %s879_s21 = scalar_select %p228_p3, %s872_s19, 3 }
   0xe   : > { %s1144_s20 = smov (!%p236_p4, %s706_s20), 56  ;;  %249 = sbr.rel (%p708_p5) target bundleno = 21 (0x15), region = 40 }
   0xf   : > { %s230_s24 = scalar_lea.vmem %s1117_s0, %s879_s21  ;;  %s707_s25 = sshll.u32 %s1144_s20, 2  ;;  %vm250_vm0 = vcmask (!%p708_p5), 261120   ;;  %vm254_vm1 = vcmask (!%p708_p5), 7168   ;;  %vm258_vm2 = vcmask (!%p708_p5), 0   ;;  %v829_v0 = vmov (!%p708_p5), 0.0  }
  0x10   : > { %s888_s28 = scalar_lea.vmem %s1118_s1, %s707_s25  ;;  %251 = vst.msk [vmem:[#allocation2] sm:$0xff] (!%p708_p5), %vm250_vm0, %v829_v0  ;;  %252 = vst.msk [vmem:[#allocation2 + $0x8] sm:$0xff] (!%p708_p5), %vm250_vm0, %v829_v0 }
  0x11   : > { %253 = vst.msk [vmem:[#allocation2 + $0x10] sm:$0xff] (!%p708_p5), %vm250_vm0, %v829_v0 }
  0x12   : > { %255 = vst.msk [vmem:[#allocation3] sm:$0xff] (!%p708_p5), %vm254_vm1, %v829_v0  ;;  %256 = vst.msk [vmem:[#allocation3 + $0x8] sm:$0xff] (!%p708_p5), %vm254_vm1, %v829_v0 }
  0x13   : > { %257 = vst.msk [vmem:[#allocation3 + $0x10] sm:$0xff] (!%p708_p5), %vm254_vm1, %v829_v0 }
  0x14   : > { %259 = vst.msk [vmem:[#allocation4] sm:$0x1] (!%p708_p5), %vm258_vm2, %v829_v0 }
  0x15 PF: > { %s709_s29 = sshll.u32 %s872_s19, 7  ;;  %v278_v1 = vlaneseq  ;;  %v261_v9 = vld [vmem:[%s888_s28] sm:$0xf]  ;;  %v262_v17 = vld [vmem:[%s888_s28 + $0x4] sm:$0xf]  ;;  %p726_p6 = scmp.ne.s32.totalorder %s872_s19, 3 }
  0x16   : > { %v892_v2 = vstv %s709_s29  ;;  %v263_v24 = vld [vmem:[%s888_s28 + $0x8] sm:$0xf]  ;;  %v264_v25 = vld [vmem:[%s888_s28 + $0xc] sm:$0xf]  ;;  %v265_v28 = vld [vmem:[%s888_s28 + $0x10] sm:$0xf] }
  0x17   : > { %v894_v3 = vshrl.u32 %v278_v1, 7  ;;  %v896_v4 = vand.u32 127, %v278_v1  ;;  %v266_v34 = vld [vmem:[%s888_s28 + $0x14] sm:$0xf]  ;;  %v267_v39 = vld [vmem:[%s888_s28 + $0x18] sm:$0xf] }
  0x18   : > { %v268_v45 = vld [vmem:[%s888_s28 + $0x1c] sm:$0xf]  ;;  %v269_v53 = vld [vmem:[%s888_s28 + $0x20] sm:$0xf]  ;;  %v270_v54 = vld [vmem:[%s888_s28 + $0x24] sm:$0xf] }
  0x19   : > { %v899_v5 = vadd.s32 8, %v894_v3  ;;  %v301_v6 = vadd.s32 %v894_v3, %v892_v2  ;;  %v904_v7 = vadd.s32 16, %v894_v3  ;;  %v288_v8 = vadd.s32 24, %v894_v3  ;;  %v260_v60 = vld [vmem:[%s230_s24] sm:$0x1]  ;;  %v620_v57 = vld [vmem:[%s1120_s3 + $0x8] sm:$0xff] (!%p726_p6) }
  0x1a   : > { %v289_v10 = vadd.s32 32, %v894_v3  ;;  %v290_v11 = vadd.s32 40, %v894_v3  ;;  %v291_v12 = vadd.s32 48, %v894_v3  ;;  %v292_v13 = vadd.s32 56, %v894_v3 }
  0x1b   : > { %v302_v14 = vadd.s32 %v899_v5, %v892_v2  ;;  %vm317_vm3 = vcmp.lt.s32.totalorder %v301_v6, 450  ;;  %v303_v15 = vadd.s32 %v904_v7, %v892_v2  ;;  %v304_v16 = vadd.s32 %v288_v8, %v892_v2 }
  0x1c   : > { %vm918_vm4 = vmpackc.low %vm317_vm3, %vm317_vm3  ;;  %v305_v19 = vadd.s32 %v289_v10, %v892_v2  ;;  %v306_v20 = vadd.s32 %v290_v11, %v892_v2  ;;  %v307_v21 = vadd.s32 %v291_v12, %v892_v2  ;;  %v308_v22 = vadd.s32 %v292_v13, %v892_v2 }
  0x1d   : > { %vm318_vm5 = vcmp.lt.s32.totalorder %v302_v14, 450  ;;  %v381_v23 = vsel %vm918_vm4, %v261_v9, 0  ;;  %vm319_vm6 = vcmp.lt.s32.totalorder %v303_v15, 450  ;;  %vm320_vm7 = vcmp.lt.s32.totalorder %v304_v16, 450  ;;  %v271_v9 = vld [vmem:[%s888_s28 + $0x28] sm:$0xf] }
  0x1e   : > { %vm366_vm8 = vmpackc.low %vm318_vm5, %vm318_vm5  ;;  %vm321_vm9 = vcmp.lt.s32.totalorder %v305_v19, 450  ;;  %vm322_vm10 = vcmp.lt.s32.totalorder %v306_v20, 450  ;;  %vm323_vm11 = vcmp.lt.s32.totalorder %v307_v21, 450  ;;  %vm324_vm12 = vcmp.lt.s32.totalorder %v308_v22, 450  ;;  %v273_v21 = vld [vmem:[%s888_s28 + $0x30] sm:$0xf] }
  0x1f   : > { %v382_v26 = vsel %vm366_vm8, %v262_v17, 0  ;;  %vm930_vm13 = vmpackc.low %vm319_vm6, %vm319_vm6  ;;  %v293_v29 = vadd.s32 64, %v894_v3  ;;  %v294_v30 = vadd.s32 72, %v894_v3  ;;  %v295_v31 = vadd.s32 80, %v894_v3  ;;  %v274_v22 = vld [vmem:[%s888_s28 + $0x34] sm:$0xf] }
  0x20   : > { %v713_v32 = vcombine.low %v381_v23, %v382_v26  ;;  %vm368_vm14 = vmpackc.low %vm320_vm7, %vm320_vm7  ;;  %v383_v33 = vsel %vm930_vm13, %v263_v24, 0  ;;  %v296_v35 = vadd.s32 88, %v894_v3  ;;  %v297_v36 = vadd.s32 96, %v894_v3 }
  0x21   : > { %v384_v37 = vsel %vm368_vm14, %v264_v25, 0  ;;  %vm945_vm15 = vmpackc.low %vm321_vm9, %vm321_vm9  ;;  %v309_v40 = vadd.s32 %v293_v29, %v892_v2  ;;  %v310_v41 = vadd.s32 %v294_v30, %v892_v2  ;;  %v311_v42 = vadd.s32 %v295_v31, %v892_v2  ;;  %v275_v30 = vld [vmem:[%s888_s28 + $0x38] sm:$0xf]  ;;  %v276_v31 = vld [vmem:[%s888_s28 + $0x3c] sm:$0xf] }
  0x22   : > { %742 = vmatprep.subr.bf16.mxu0 %v713_v32  ;;  %v714_v43 = vcombine.low %v383_v33, %v384_v37  ;;  %vm370_vm0 = vmpackc.low %vm322_vm10, %vm322_vm10  ;;  %v385_v44 = vsel %vm945_vm15, %v265_v28, 0  ;;  %v312_v46 = vadd.s32 %v296_v35, %v892_v2  ;;  %v298_v47 = vadd.s32 104, %v894_v3  ;;  %v518_v35 = vld [vmem:[#allocation3] sm:$0xff] }
  0x23   : > { %743 = vmatpush3.bf16.msra.mxu0 %v713_v32  ;;  %v386_v48 = vsel %vm370_vm0, %v266_v34, 0  ;;  %vm962_vm1 = vmpackc.low %vm323_vm11, %vm323_vm11  ;;  %vm325_vm2 = vcmp.lt.s32.totalorder %v309_v40, 450  ;;  %vm326_vm3 = vcmp.lt.s32.totalorder %v310_v41, 450  ;;  %vm327_vm6 = vcmp.lt.s32.totalorder %v311_v42, 450  ;;  %v519_v41 = vld [vmem:[#allocation3 + $0x8] sm:$0xff] }
  0x24   : > { %744 = vmatprep.subr.bf16.mxu0 %v714_v43  ;;  %v715_v50 = vcombine.low %v385_v44, %v386_v48  ;;  %vm372_vm4 = vmpackc.low %vm324_vm12, %vm324_vm12  ;;  %v387_v51 = vsel %vm962_vm1, %v267_v39, 0  ;;  %v313_v56 = vadd.s32 %v297_v36, %v892_v2  ;;  %vm328_vm8 = vcmp.lt.s32.totalorder %v312_v46, 450  ;;  %v520_v36 = vld [vmem:[#allocation3 + $0x10] sm:$0xff]  ;;  %v534_v42 = vld [vmem:[#allocation4] sm:$0x1] }
  0x25   : > { %v388_v52 = vsel %vm372_vm4, %v268_v45, 0  ;;  %vm972_vm5 = vmpackc.low %vm325_vm2, %vm325_vm2  ;;  %v314_v58 = vadd.s32 %v298_v47, %v892_v2  ;;  %v299_v59 = vadd.s32 112, %v894_v3  ;;  %v281_v61 = vadd.s32 %v892_v2, %v896_v4  ;;  %v272_v4 = vld [vmem:[%s888_s28 + $0x2c] sm:$0xf]  ;;  %v406_v46 = vld [vmem:[#allocation2 + $0x10] sm:$0xff] }
  0x26   : > { %vm977_vm7 = vmpackc.low %vm326_vm3, %vm326_vm3  ;;  %v716_v62 = vcombine.low %v387_v51, %v388_v52  ;;  %v300_v63 = vadd.s32 120, %v894_v3  ;;  %v389_v0 = vsel %vm972_vm5, %v269_v53, 0  ;;  %v399_v8 = vsub.s32 0, %v894_v3  ;;  %v404_v47 = vld [vmem:[#allocation2] sm:$0xff]  ;;  %v405_v51 = vld [vmem:[#allocation2 + $0x8] sm:$0xff] }
  0x27   : > { %745 = vmatpush3.bf16.msra.mxu0 %v714_v43  ;;  %v390_v1 = vsel %vm977_vm7, %v270_v54, 0  ;;  %vm995_vm9 = vmpackc.low %vm327_vm6, %vm327_vm6  ;;  %vm282_vm10 = vcmp.lt.s32.totalorder %v281_v61, 450  ;;  %vm329_vm12 = vcmp.lt.s32.totalorder %v313_v56, 450  ;;  %vm330_vm13 = vcmp.lt.s32.totalorder %v314_v58, 450  ;;  %v621_v58 = vld [vmem:[%s1120_s3 + $0x10] sm:$0x7] (!%p726_p6) }
  0x28   : > { %746 = vmatprep.subr.bf16.mxu0 %v715_v50  ;;  %vm1004_vm11 = vmpackc.low %vm328_vm8, %vm328_vm8  ;;  %v283_v11 = vsel %vm282_vm10, %v260_v60, 255  ;;  %v315_v12 = vadd.s32 %v299_v59, %v892_v2  ;;  %v717_v14 = vcombine.low %v389_v0, %v390_v1  ;;  %v316_v15 = vadd.s32 %v300_v63, %v892_v2  ;;  %v619_v1 = vld [vmem:[%s1120_s3] sm:$0xff] (!%p726_p6) }
  0x29   : > { %v400_v13 = vrot.slane %v283_v11, %v399_v8  ;;  %vm535_vm14 = vcmp.ne.s32.totalorder %v283_v11, 255  ;;  %v391_v16 = vsel %vm995_vm9, %v271_v9, 0  ;;  %v392_v17 = vsel %vm1004_vm11, %v272_v4, 0  ;;  %vm1014_vm15 = vmpackc.low %vm329_vm12, %vm329_vm12 }
  0x2a   : > { %v830_v2 = vmov 0.0   ;;  %vm538_vm4 = vcmask 1040384   ;;  %vm1027_vm5 = vmpackc.low %vm330_vm13, %vm330_vm13  ;;  %vm331_vm6 = vcmp.lt.s32.totalorder %v315_v12, 450  ;;  %vm332_vm7 = vcmp.lt.s32.totalorder %v316_v15, 450 }
  0x2b   : > { %747 = vmatpush3.bf16.msra.mxu0 %v715_v50  ;;  %vm401_vm0 = vcmp.eq.s32.totalorder %v894_v3, %v400_v13  ;;  %vm402_vm1 = vcmp.eq.s32.totalorder %v899_v5, %v400_v13  ;;  %vm403_vm3 = vcmp.eq.s32.totalorder %v904_v7, %v400_v13  ;;  %v725_v20 = vsel %vm535_vm14, 1.0, %v830_v2  ;;  %vm379_vm8 = vmpackc.low %vm331_vm6, %vm331_vm6 }
  0x2c   : > { %748 = vmatprep.subr.bf16.mxu0 %v716_v62  ;;  %vm721_vm2 = vmpackc.low %vm402_vm1, %vm401_vm0  ;;  %v710_v19 = vsel %vm401_vm0, 1.0, %v830_v2  ;;  %v831_v3 = vmov 1.0|1.0   ;;  %v712_v24 = vsel %vm403_vm3, 1.0, %v830_v2  ;;  %v711_v25 = vsel %vm402_vm1, 1.0, %v830_v2 }
  0x2d   : > { %758 = vmatprep.mubr.msk.bf16.mxu0 %vm721_vm2, %v831_v3  ;;  %521 = vadd.xlane.f32.xlu0 %v710_v19  ;;  %v718_v26 = vcombine.low %v391_v16, %v392_v17  ;;  %v539_v27 = vsel %vm538_vm4, %v725_v20, 0.0  ;;  %v393_v28 = vsel %vm1014_vm15, %v273_v21, 0  ;;  %v394_v29 = vsel %vm1027_vm5, %v274_v22, 0  ;;  %vm380_vm9 = vmpackc.low %vm332_vm7, %vm332_vm7  ;;  %v585_v21 = vld [vmem:[%s1119_s2] sm:$0xff] (!%p726_p6)  ;;  %v587_v22 = vld [vmem:[%s1119_s2 + $0x10] sm:$0x7] (!%p726_p6) }
  0x2e   : > { %525 = vadd.xlane.f32.xlu1 %v712_v24  ;;  %v719_v32 = vcombine.low %v393_v28, %v394_v29  ;;  %v395_v5 = vsel %vm379_vm8, %v275_v30, 0  ;;  %v396_v33 = vsel %vm380_vm9, %v276_v31, 0  ;;  %vm723_vm10 = vmpackc.low %vm403_vm3, %vm403_vm3  ;;  %vm530_vm11 = vcmask 7168   ;;  %v586_v30 = vld [vmem:[%s1119_s2 + $0x8] sm:$0xff] (!%p726_p6) }
  0x2f   : > { %749 = vmatpush3.bf16.msra.mxu0 %v716_v62  ;;  %v720_v34 = vcombine.low %v395_v5, %v396_v33  ;;  %vm543_vm12 = vcmask 0   ;;  %vm514_vm13 = vcmask 261120   ;;  %v832_v59 = vmov (!%p726_p6), 0  }
  0x30   : > { %750 = vmatprep.subr.bf16.mxu0 %v717_v14  ;;  %784 = vset.pattern.permute.xlu1 (!%p726_p6), %v832_v59  ;;  %vm637_vm15 = vcmask (!%p726_p6), 2048   ;;  %v591_v24 = vmul.f32 (!%p726_p6), 0.9, %v585_v21  ;;  %v592_v33 = vmul.f32 (!%p726_p6), 0.9, %v586_v30  ;;  %vm617_vm3 = vcmask (!%p726_p6), 256000  }
  0x31   : > { %523 = vadd.xlane.f32.xlu0 %v711_v25 }
  0x32   : > { %540 = vadd.xlane.f32.xlu1 %v539_v27  ;;  %783 = vset.pattern.permute.xlu0 (!%p726_p6), %v832_v59 }
  0x33   : > { %751 = vmatpush3.bf16.msra.mxu0 %v717_v14 }
  0x34   : > { %752 = vmatprep.subr.bf16.mxu0 %v718_v26 }
  0x37   : > { %753 = vmatpush3.bf16.msra.mxu0 %v718_v26  ;;  %v593_v26 = vmul.f32 (!%p726_p6), 0.9, %v587_v22 }
  0x38   : > { %754 = vmatprep.subr.bf16.mxu0 %v719_v32 }
  0x3b   : > { %755 = vmatpush3.bf16.msra.mxu0 %v719_v32 }
  0x3c   : > { %756 = vmatprep.subr.bf16.mxu0 %v720_v34 }
  0x3f   : > { %757 = vmatpush3.bf16.msra.mxu0 %v720_v34 }
  0x42   : > { %759 = vmatmul.mubr.msk.bf16.vlgmr.msra.gmra.mrb[0].mxu0 %vm723_vm10, %v831_v3 }
  0xba   : > { %v522_v37 = vpop.xlane.xlu0 %521 }
  0xbb   : > { %v526_v38 = vpop.xlane.xlu1 %525  ;;  %v527_v39 = vadd.f32 %v522_v37, %v518_v35 }
  0xbc   : > { %v529_v40 = vadd.f32 %v526_v38, %v520_v36 }
  0xbd   : > { %531 = vst.msk [vmem:[#allocation3] sm:$0xff] %vm530_vm11, %v527_v39 }
  0xbe   : > { %533 = vst.msk [vmem:[#allocation3 + $0x10] sm:$0xff] %vm530_vm11, %v529_v40  ;;  %v524_v43 = vpop.xlane.xlu0 %523 }
  0xbf   : > { %v541_v44 = vpop.xlane.xlu1 %540  ;;  %v528_v7 = vadd.f32 %v524_v43, %v519_v41 }
  0xc0   : > { %v542_v45 = vadd.f32 %v541_v44, %v534_v42 }
  0xc1   : > { %532 = vst.msk [vmem:[#allocation3 + $0x8] sm:$0xff] %vm530_vm11, %v528_v7 }
  0xc2   : > { %544 = vst.msk [vmem:[#allocation4] sm:$0x1] %vm543_vm12, %v542_v45 }
  0xc4   : > { %v549_v62 = vld [vmem:[#allocation3] sm:$0xff] (!%p726_p6) }
  0xc5   : > { %v551_v56 = vld [vmem:[#allocation3 + $0x10] sm:$0x7] (!%p726_p6)  ;;  %vm552_vm1 = vcmp.gt.f32.partialorder (!%p726_p6), %v549_v62, 0.0 }
  0xc6   : > { %vm554_vm14 = vcmp.gt.f32.partialorder (!%p726_p6), %v551_v56, 0.0  ;;  %v555_v10 = vsel (!%p726_p6), %vm552_vm1, %v549_v62, 1.0  ;;  %v597_v15 = vsel (!%p726_p6), %vm552_vm1, 1, %v832_v59 }
  0xc7   : > { %v557_v63 = vsel (!%p726_p6), %vm554_vm14, %v551_v56, 1.0  ;;  %v599_v17 = vsel (!%p726_p6), %vm554_vm14, 1, %v832_v59 }
  0xc8   : > { %v550_v61 = vld [vmem:[#allocation3 + $0x8] sm:$0xff] (!%p726_p6)  ;;  %785 = vrcp.f32 (!%p726_p6), %v557_v63 }
  0xc9   : > { %v727_v60 = vld [vmem:[#allocation4] ss:$0 sm:$0xff] (!%p726_p6)  ;;  %vm553_vm0 = vcmp.gt.f32.partialorder (!%p726_p6), %v550_v61, 0.0  ;;  %787 = vrcp.f32 (!%p726_p6), %v555_v10 }
  0xca   : > { %v631_v0 = vsel (!%p726_p6), %vm554_vm14, %v727_v60, 0.0  ;;  %v630_v8 = vsel (!%p726_p6), %vm553_vm0, %v727_v60, 0.0  ;;  %v556_v9 = vsel (!%p726_p6), %vm553_vm0, %v550_v61, 1.0  ;;  %v629_v11 = vsel (!%p726_p6), %vm552_vm1, %v727_v60, 0.0 }
  0xcb   : > { %v634_v6 = vadd.f32 (!%p726_p6), %v631_v0, %v621_v58  ;;  %v633_v4 = vadd.f32 (!%p726_p6), %v630_v8, %v620_v57  ;;  %v632_v12 = vadd.f32 (!%p726_p6), %v629_v11, %v619_v1  ;;  %789 = vrcp.f32 (!%p726_p6), %v556_v9 }
  0xcc   : > { %v598_v18 = vsel (!%p726_p6), %vm553_vm0, 1, %v832_v59 }
  0xcd   : > { %638 = vst.msk [vmem:[%s1122_s5 + $0x10] sm:$0x7] (!%p726_p6), %vm637_vm15, %v634_v6 }
  0xce   : > { %636 = vst.msk [vmem:[%s1122_s5 + $0x8] sm:$0xff] (!%p726_p6), %vm530_vm11, %v633_v4  ;;  %635 = vst.msk [vmem:[%s1122_s5] sm:$0xff] (!%p726_p6), %vm530_vm11, %v632_v12 }
  0xd2   : > { %v786_v13 = vpop.eup (!%p726_p6), %785 }
  0xd3   : > { %579 = vperm.xlu1 (!%p726_p6), %784, %v786_v13   ;;  %v788_v14 = vpop.eup (!%p726_p6), %787 }
  0xd4   : > { %569 = vperm.xlu0 (!%p726_p6), %783, %v788_v14  }
  0xd5   : > { %v790_v16 = vpop.eup (!%p726_p6), %789 }
  0xd7   : > { %601 = vperm.xlu1 (!%p726_p6), %784, %v597_v15  }
  0xd8   : > { %574 = vperm.xlu0 (!%p726_p6), %783, %v790_v16  }
  0xdb   : > { %607 = vperm.xlu1 (!%p726_p6), %784, %v599_v17  }
  0xdc   : > { %604 = vperm.xlu0 (!%p726_p6), %783, %v598_v18  }
 0x115   : > { %v760_v48 = vpop.f32.mrb[0].mxu0  ;;  %548 = sbr.rel (%p726_p6) target bundleno = 352 (0x160), region = 44 }
 0x116   : > { %v513_v49 = vadd.f32 %v760_v48, %v406_v46  ;;  %v497_v50 = vpop.f32.mrb[1].mxu0 }
 0x117   : > { %v511_v52 = vadd.f32 %v497_v50, %v404_v47  ;;  %v761_v53 = vpop.f32.mrb[2].mxu0 }
 0x118   : > { %517 = vst.msk [vmem:[#allocation2 + $0x10] sm:$0xff] %vm514_vm13, %v513_v49  ;;  %v500_v54 = vpop.f32.mrb[3].mxu0 }
 0x119   : > { %515 = vst.msk [vmem:[#allocation2] sm:$0xff] %vm514_vm13, %v511_v52  ;;  %v512_v55 = vadd.f32 %v500_v54, %v405_v51 }
 0x11b   : > { %516 = vst.msk [vmem:[#allocation2 + $0x8] sm:$0xff] %vm514_vm13, %v512_v55 }
 0x11f   : > { %v566_v2 = vld [vmem:[#allocation2 + $0x10] sm:$0x7] }
 0x120   : > { %v564_v20 = vld [vmem:[#allocation2] sm:$0xff] }
 0x122   : > { %v565_v29 = vld [vmem:[#allocation2 + $0x8] sm:$0xff] }
 0x152   : > { %v580_v19 = vpop.permute.xlu1 %579 }
 0x153   : > { %v584_v23 = vmul.f32 %v580_v19, %v566_v2  ;;  %v570_v3 = vpop.permute.xlu0 %569 }
 0x154   : > { %v582_v25 = vmul.f32 %v570_v3, %v564_v20 }
 0x155   : > { %v590_v27 = vmul.f32 0.1, %v584_v23 }
 0x156   : > { %v602_v28 = vpop.permute.xlu1 %601  ;;  %v588_v31 = vmul.f32 0.1, %v582_v25 }
 0x157   : > { %vm609_vm2 = vcmp.eq.s32.totalorder %v602_v28, 1  ;;  %v575_v32 = vpop.permute.xlu0 %574  ;;  %v596_v35 = vadd.f32 %v593_v26, %v590_v27 }
 0x158   : > { %v594_v5 = vadd.f32 %v591_v24, %v588_v31  ;;  %v583_v34 = vmul.f32 %v575_v32, %v565_v29 }
 0x15a   : > { %v608_v36 = vpop.permute.xlu1 %607  ;;  %v612_v37 = vsel %vm609_vm2, %v594_v5, %v585_v21  ;;  %v589_v38 = vmul.f32 0.1, %v583_v34 }
 0x15b   : > { %vm611_vm4 = vcmp.eq.s32.totalorder %v608_v36, 1  ;;  %615 = vst.msk [vmem:[#allocation5] sm:$0xff] %vm514_vm13, %v612_v37  ;;  %v605_v40 = vpop.permute.xlu0 %604 }
 0x15c   : > { %v614_v39 = vsel %vm611_vm4, %v596_v35, %v587_v22  ;;  %v595_v41 = vadd.f32 %v592_v33, %v589_v38  ;;  %vm610_vm5 = vcmp.eq.s32.totalorder %v605_v40, 1 }
 0x15d   : > { %618 = vst.msk [vmem:[#allocation5 + $0x10] sm:$0x7] %vm617_vm3, %v614_v39 }
 0x15e   : > { %v613_v42 = vsel %vm610_vm5, %v595_v41, %v586_v30 }
 0x15f   : > { %616 = vst.msk [vmem:[#allocation5 + $0x8] sm:$0xff] %vm514_vm13, %v613_v42 }
 0x160 PF: > { %p766_p7 = scmp.eq.s32.totalorder %s872_s19, 3  ;;  %s833_s27 = smov [#allocation5]  }
 0x161   : > { %s645_s28 = sshll.u32 %s833_s27, 4  ;;  %s646_s28 = int_to_ptr.vmem [resolvable:$true] %s645_s28 }
 0x162   : > { %s791_s29 = scalar_lea.vmem %s646_s28, 384  ;;  %p798_p11 = scmp.lt.s32.totalorder %s646_s28, %s646_s28 }
 0x163   : > { %p792_p8 = scmp.ne.s32.totalorder %s646_s28, %s791_s29  ;;  %p799_p12 = scmp.lt.s32.totalorder %s791_s29, %s791_s29 }
 0x165   : > { %p793_p9 = pnand %p792_p8, %p766_p7  ;;  %p800_p13 = por %p799_p12, %p798_p11 }
 0x167   : > { %p794_p10 = pneg %p793_p9 }
 0x169   : > { %p801_p0 = pnand %p800_p13, %p794_p10 }
 0x16b   : > { %804 = shalt.err (!%p801_p0)
}
 0x16c   : > { %s805_s7 = scalar_lea.hbm %s1121_s4, 384 }
 0x16d   : > { %p806_p1 = scmp.ne.s32.totalorder %s1121_s4, %s805_s7  ;;  %p811_p4 = scmp.lt.u32.totalorder %s805_s7, %s1121_s4 }
 0x16f   : > { %p807_p2 = pnand %p806_p1, %p766_p7 }
 0x171   : > { %p808_p3 = pneg %p807_p2 }
 0x173   : > { %p813_p5 = pnand %p811_p4, %p808_p3 }
 0x175   : > { %816 = shalt.err (!%p813_p5)
}
 0x176   : > { %s834_s12 = smov 128   ;;  %s835_s13 = smov 8  }
 0x177   : > { %763 = dma.vmem_to_hbm [thread:$0]  (%p766_p7), %s646_s28, 384, %s1121_s4, [#allocation6], %s834_s12, %s834_s12, %s835_s13  }
 0x178   : > { %822 = dma.done.wait (%p766_p7), [#allocation6], 384  }
 0x179   : > { %824 = vsyncadd (%p766_p7), [#allocation6], 4294966912 }
 0x17a PF: > { %s17_s18 = sadd.s32 1, %s827_s18  }
 0x17b   : > { %p14_p6 = scmp.ge.s32.totalorder %s17_s18, 6  }
 0x17d   :  { %16 = sbr.rel (!%p14_p6) target bundleno = 1 (0x1), region = 82 }
 0x184   :  { %667 = vsyncpa [#allocation6], 1 }
 0x185   :  { %669 = vsyncpa [#allocation6 + $0x1], 1 }

</bundles_post_ra>
